<compile_context>
chip_gen: v6e
topology: v6e:2x2x1
jax: 0.10.0
libtpu: 0.0.40
codegen_flags: <defaults>
</compile_context>

<pallas_src>
import functools

import jax
import jax.numpy as jnp
from jax.experimental import pallas as pl
from jax.experimental.pallas import tpu as pltpu


def _disc_kernel(u_ref, b_ref, hpl_ref, hmi_ref, *rest, has_sb1, has_sb2):
    """Per-tile DGI discriminator scores.

    u_ref:   (1, n_h)       VMEM, resident across grid (u = W @ c)
    b_ref:   (1, 1)         SMEM scalar bilinear bias
    hpl_ref: (TILE_N, n_h)  VMEM, streamed tile of positive embeddings
    hmi_ref: (TILE_N, n_h)  VMEM, streamed tile of corrupted embeddings
    rest:    optional (TILE_N, 1) s_bias tiles, then the (2, TILE_N) output
    """
    rest = list(rest)
    out_ref = rest[-1]
    idx = 0
    sb1_ref = None
    sb2_ref = None
    if has_sb1:
        sb1_ref = rest[idx]
        idx += 1
    if has_sb2:
        sb2_ref = rest[idx]
        idx += 1

    u = u_ref[...].astype(jnp.float32)                   # (1, n_h)
    b = b_ref[0, 0].astype(jnp.float32)

    # Native-dtype streams; upcast per-tile, accumulate in f32.
    hpl = hpl_ref[...].astype(jnp.float32)               # (TILE_N, n_h)
    hmi = hmi_ref[...].astype(jnp.float32)

    # Bilinear with out_features == 1: row-wise dot against u = W @ c.
    s1 = jnp.sum(hpl * u, axis=1, keepdims=True) + b     # (TILE_N, 1)
    s2 = jnp.sum(hmi * u, axis=1, keepdims=True) + b     # (TILE_N, 1)

    if has_sb1:
        s1 = s1 + sb1_ref[...].astype(jnp.float32)
    if has_sb2:
        s2 = s2 + sb2_ref[...].astype(jnp.float32)

    # Lane-dense output slab: (2, TILE_N) rows instead of an (N, 2) column pair.
    out_ref[...] = jnp.concatenate([s1, s2], axis=1).T.astype(out_ref.dtype)


def discriminator_forward(c, h_pl, h_mi, weight, bias,
                          s_bias1=None, s_bias2=None, *, tile_n=512):
    """Pallas implementation of Discriminator.forward.

    c:      (n_h,)        graph summary vector
    h_pl:   (N, n_h)      positive node embeddings (any float dtype)
    h_mi:   (N, n_h)      corrupted node embeddings (any float dtype)
    weight: (1, n_h, n_h) Bilinear weight
    bias:   (1,)          Bilinear bias
    returns logits (N, 2) float32
    """
    N, n_h = h_pl.shape

    w2 = jnp.reshape(weight, (n_h, n_h)).astype(jnp.float32)
    c2 = jnp.reshape(c, (n_h,)).astype(jnp.float32)
    # Hoist the tiny (n_h, n_h) matvec once; the kernel then only streams h.
    u = jnp.dot(w2, c2, precision=jax.lax.Precision.HIGHEST)       # (n_h,)
    u = jnp.reshape(u, (1, n_h))
    b2 = jnp.reshape(bias, (1, 1)).astype(jnp.float32)

    # Tile over N.  Per-step VMEM ~ 2 streams x 2 buffers x tile_n x n_h x itemsize
    # (+ resident u): tile_n=512 @ n_h=512 f32 is ~4 MiB -- comfortably inside the
    # 32 MiB scoped default on v5e/v6e and well under v7x's 64 MiB physical VMEM.
    if N <= tile_n:
        tile_n = N                                   # single full-extent block
    else:
        tile_n = max(128, (tile_n // 128) * 128)     # lane-dense out + sublane align
    grid = (pl.cdiv(N, tile_n),)                     # ragged tail masked by Pallas

    in_specs = [
        pl.BlockSpec((1, n_h), lambda i: (0, 0)),                       # u (resident)
        pl.BlockSpec((1, 1), lambda i: (0, 0),
                     memory_space=pltpu.MemorySpace.SMEM),              # bias scalar
        pl.BlockSpec((tile_n, n_h), lambda i: (i, 0)),                  # h_pl tiles
        pl.BlockSpec((tile_n, n_h), lambda i: (i, 0)),                  # h_mi tiles
    ]
    args = [u, b2, h_pl, h_mi]          # h streams keep their native dtype

    has_sb1 = s_bias1 is not None
    has_sb2 = s_bias2 is not None
    if has_sb1:
        in_specs.append(pl.BlockSpec((tile_n, 1), lambda i: (i, 0)))
        args.append(jnp.reshape(s_bias1, (N, 1)))
    if has_sb2:
        in_specs.append(pl.BlockSpec((tile_n, 1), lambda i: (i, 0)))
        args.append(jnp.reshape(s_bias2, (N, 1)))

    kernel = functools.partial(_disc_kernel, has_sb1=has_sb1, has_sb2=has_sb2)

    scores_t = pl.pallas_call(
        kernel,
        out_shape=jax.ShapeDtypeStruct((2, N), jnp.float32),
        grid=grid,
        in_specs=in_specs,
        out_specs=pl.BlockSpec((2, tile_n), lambda i: (0, i)),
        compiler_params=pltpu.CompilerParams(
            dimension_semantics=("parallel",),   # shard N tiles across TCs on v7x
        ),
    )(*args)

    return scores_t.T                            # (N, 2): col 0 = sc_1, col 1 = sc_2


def _xavier_uniform(key, shape):
    # PyTorch xavier_uniform_ on Bilinear weight (out, in1, in2):
    #   fan_in = in1 * in2, fan_out = out * in2
    out_f, in1, in2 = shape
    fan_in = in1 * in2
    fan_out = out_f * in2
    bound = (6.0 / (fan_in + fan_out)) ** 0.5
    return jax.random.uniform(key, shape, jnp.float32, -bound, bound)


if __name__ == "__main__":
    n_h = 32     # hidden dim
    N = 1000     # not a multiple of the tile -> exercises the masked tail block

    key = jax.random.PRNGKey(0)
    k_w, k_c, k_pl, k_mi, k_s1, k_s2 = jax.random.split(key, 6)

    weight = _xavier_uniform(k_w, (1, n_h, n_h))
    bias = jnp.zeros((1,), jnp.float32)

    c = jax.random.normal(k_c, (n_h,), jnp.float32)
    h_pl = jax.random.normal(k_pl, (N, n_h), jnp.float32)
    h_mi = jax.random.normal(k_mi, (N, n_h), jnp.float32)

    logits = discriminator_forward(c, h_pl, h_mi, weight, bias, tile_n=256)
    logits = jax.block_until_ready(logits)

    # Pure-JAX reference of the Bilinear(out_features=1) forward.
    w0 = weight[0]
    u_ref = jnp.dot(w0, c, precision=jax.lax.Precision.HIGHEST)
    sc1_ref = jnp.dot(h_pl, u_ref, precision=jax.lax.Precision.HIGHEST) + bias[0]
    sc2_ref = jnp.dot(h_mi, u_ref, precision=jax.lax.Precision.HIGHEST) + bias[0]
    ref = jnp.stack([sc1_ref, sc2_ref], axis=1)

    assert logits.shape == (N, 2)
    assert jnp.allclose(logits, ref, atol=1e-4, rtol=1e-4)

    # Optional score-bias path (folded into the kernel epilogue).
    s_bias1 = jax.random.normal(k_s1, (N, 1), jnp.float32)
    s_bias2 = jax.random.normal(k_s2, (N, 1), jnp.float32)
    logits_b = discriminator_forward(c, h_pl, h_mi, weight, bias,
                                     s_bias1, s_bias2, tile_n=256)
    logits_b = jax.block_until_ready(logits_b)
    ref_b = ref + jnp.concatenate([s_bias1, s_bias2], axis=1)
    assert jnp.allclose(logits_b, ref_b, atol=1e-4, rtol=1e-4)

    print("KERNEL_OK")
</pallas_src>

<mosaic_0001>
module attributes {stable_mosaic.version = 11 : i64} {
  func.func @_disc_kernel(%arg0: i32, %arg1: memref<1x32xf32, #tpu.memory_space<vmem>>, %arg2: memref<1x1xf32, #tpu.memory_space<smem>>, %arg3: memref<256x32xf32, #tpu.memory_space<vmem>>, %arg4: memref<256x32xf32, #tpu.memory_space<vmem>>, %arg5: memref<2x256xf32, #tpu.memory_space<vmem>>) attributes {dimension_semantics = [#tpu.dimension_semantics<parallel>], iteration_bounds = array<i64: 4>, scalar_prefetch = 0 : i64, scratch_operands = 0 : i64, tpu.core_type = #tpu.core_type<tc>, window_params = [{pipeline_mode = #tpu.pipeline_mode<synchronous>, transform_indices = @transform_0, window_bounds = array<i64: 1, 32>}, {transform_indices = @transform_1, window_bounds = array<i64: 1, 1>}, {transform_indices = @transform_2, window_bounds = array<i64: 256, 32>}, {transform_indices = @transform_3, window_bounds = array<i64: 256, 32>}, {transform_indices = @transform_4, window_bounds = array<i64: 2, 256>}]} {
    %c0 = arith.constant 0 : index
    %c0_0 = arith.constant 0 : index
    %0 = vector.load %arg1[%c0, %c0_0] : memref<1x32xf32, #tpu.memory_space<vmem>>, vector<1x32xf32>
    %c0_1 = arith.constant 0 : index
    %c0_2 = arith.constant 0 : index
    %1 = memref.load %arg2[%c0_1, %c0_2] : memref<1x1xf32, #tpu.memory_space<smem>>
    %c0_3 = arith.constant 0 : index
    %c0_4 = arith.constant 0 : index
    %2 = vector.load %arg3[%c0_3, %c0_4] : memref<256x32xf32, #tpu.memory_space<vmem>>, vector<256x32xf32>
    %c0_5 = arith.constant 0 : index
    %c0_6 = arith.constant 0 : index
    %3 = vector.load %arg4[%c0_5, %c0_6] : memref<256x32xf32, #tpu.memory_space<vmem>>, vector<256x32xf32>
    %4 = vector.broadcast %0 : vector<1x32xf32> to vector<256x32xf32>
    %5 = arith.mulf %2, %4 : vector<256x32xf32>
    %cst = arith.constant dense<0.000000e+00> : vector<256xf32>
    %6 = vector.multi_reduction <add>, %5, %cst [1] : vector<256x32xf32> to vector<256xf32>
    %7 = vector.shape_cast %6 : vector<256xf32> to vector<256x1xf32>
    %8 = vector.broadcast %1 : f32 to vector<256x1xf32>
    %9 = arith.addf %7, %8 : vector<256x1xf32>
    %10 = vector.broadcast %0 : vector<1x32xf32> to vector<256x32xf32>
    %11 = arith.mulf %3, %10 : vector<256x32xf32>
    %cst_7 = arith.constant dense<0.000000e+00> : vector<256xf32>
    %12 = vector.multi_reduction <add>, %11, %cst_7 [1] : vector<256x32xf32> to vector<256xf32>
    %13 = vector.shape_cast %12 : vector<256xf32> to vector<256x1xf32>
    %14 = vector.broadcast %1 : f32 to vector<256x1xf32>
    %15 = arith.addf %13, %14 : vector<256x1xf32>
    %16 = tpu.concatenate %9, %15 in 1 : vector<256x1xf32>, vector<256x1xf32> -> vector<256x2xf32>
    %17 = tpu.transpose %16, [1, 0] : vector<256x2xf32> -> vector<2x256xf32>
    %c0_8 = arith.constant 0 : index
    %c0_9 = arith.constant 0 : index
    %18 = vector.load %arg5[%c0_8, %c0_9] : memref<2x256xf32, #tpu.memory_space<vmem>>, vector<2x256xf32>
    tpu.vector_store %arg5[%c0_8, %c0_9], %17 {strides = array<i32>} : memref<2x256xf32, #tpu.memory_space<vmem>>, vector<2x256xf32>,
    return
  }
  func.func @transform_0(%arg0: i32) -> (i32, i32) {
    %c0_i32 = arith.constant 0 : i32
    %c0_i32_0 = arith.constant 0 : i32
    %c0_i32_1 = arith.constant 0 : i32
    return %c0_i32, %c0_i32_0 : i32, i32
  }
  func.func @transform_1(%arg0: i32) -> (i32, i32) {
    %c0_i32 = arith.constant 0 : i32
    %c0_i32_0 = arith.constant 0 : i32
    %c0_i32_1 = arith.constant 0 : i32
    return %c0_i32, %c0_i32_0 : i32, i32
  }
  func.func @transform_2(%arg0: i32) -> (i32, i32) {
    %c0_i32 = arith.constant 0 : i32
    %c0_i32_0 = arith.constant 0 : i32
    return %arg0, %c0_i32 : i32, i32
  }
  func.func @transform_3(%arg0: i32) -> (i32, i32) {
    %c0_i32 = arith.constant 0 : i32
    %c0_i32_0 = arith.constant 0 : i32
    return %arg0, %c0_i32 : i32, i32
  }
  func.func @transform_4(%arg0: i32) -> (i32, i32) {
    %c0_i32 = arith.constant 0 : i32
    %c0_i32_0 = arith.constant 0 : i32
    return %c0_i32, %arg0 : i32, i32
  }
}

</mosaic_0001>

<bundles_post_ra>
// kernel: tpu_custom_call.1
= control target key start
LH: loop header
LB: loop body
LE: loop exit
PB: predicated region body
PF: predicated region fallthrough
CT: control target
= control target key end

     0   :  { %s1585_s0 = inlined_call_operand.vmem [shape: f32[1,32], index: 0, kind: input, shape index: {}]   ;;  %s1586_s1 = inlined_call_operand.<no memory space> [shape: f32[1,1], index: 1, kind: input, shape index: {}]   ;;  %s1587_s2 = inlined_call_operand.vmem [shape: f32[1000,32], index: 2, kind: input, shape index: {}]   ;;  %s1588_s3 = inlined_call_operand.vmem [shape: f32[1000,32], index: 3, kind: input, shape index: {}]   ;;  %s1589_s4 = inlined_call_operand.hbm [shape: f32[2,1000], index: 4, kind: output, shape index: {}]  }
   0x1   :  { %9 = sst [smem:[#allocation2]] %s1586_s1 }
   0x2   :  { %10 = vsyncpa [#allocation4], 0 }
   0x3   :  { %12 = vsyncpa [#allocation4 + $0x1], 0  ;;  %s998_s17 = smov 0   ;;  %s1000_s18 = smov 0  }
   0x4   :  { %s1002_s19 = smov 0   ;;  %s1004_s20 = smov 0  }
   0x5 LB: > { %s1019_s1 = sadd.s32 4294967295, %s967_s20   ;;  %s851_s21 = sadd.s32 4294967294, %s967_s20   ;;  %s967_s20 = sphi %s1004_s20, %s1595_s20   ;;  %s963_s19 = sphi %s1002_s19, %s1594_s19   ;;  %s959_s18 = sphi %s1000_s18, %s1593_s18   ;;  %s955_s17 = sphi %s998_s17, %s1592_s17  }
   0x6   : > { %s1023_s22 = sadd.s32 1, %s967_s20   ;;  %s119_s23 = sadd.s32 1, %s963_s19 }
   0x7   : > { %s116_s24 = ssub.s32 %s967_s20, %s1023_s22  ;;  %p129_p0 = scmp.ne.s32.totalorder %s963_s19, %s959_s18 }
   0x8   : > { %p117_p1 = scmp.eq.s32.totalorder %s116_s24, 0  ;;  %p130_p2 = scmp.eq.s32.totalorder %s1019_s1, 3 }
   0x9   : > { %p135_p3 = scmp.ne.s32.totalorder %s959_s18, %s955_s17  ;;  %p136_p4 = scmp.eq.s32.totalorder %s851_s21, 3 }
   0xa   : > { %s1034_s25 = scalar_select %p117_p1, %s963_s19, %s119_s23  }
   0xb   : > { %p1036_p5 = por %p130_p2, %p129_p0  ;;  %p1040_p6 = por %p136_p4, %p135_p3 }
   0xc   : > { %p854_p7 = scmp.ge.s32.totalorder %s967_s20, 1  ;;  %p194_p8 = scmp.lt.s32.totalorder %s967_s20, 5 }
   0xe   : > { %p195_p9 = pnand %p854_p7, %p194_p8 }
   0xf   : > { %s856_s28 = sshll.u32 (!%p195_p9), %s1019_s1, 5  ;;  %s263_s12 = sld [smem:[#allocation2]] (!%p195_p9) }
  0x10   : > { %198 = sbr.rel (%p195_p9) target bundleno = 381 (0x17d), region = 36  ;;  %p238_p10 = scmp.lt.s32.totalorder (!%p195_p9), %s856_s28, 124 }
  0x11   : > { %s230_s13 = sand.u32 (!%p195_p9), 1, %s959_s18   ;;  %s867_s15 = sshll.u32 (!%p195_p9), %s1019_s1, 6 }
  0x12   : > { %s855_s14 = sshll.u32 (!%p195_p9), %s230_s13, 2  ;;  %s969_s5 = smov (!%p195_p9), [#allocation3]  }
  0x13   : > { %s232_s16 = scalar_lea.vmem (!%p195_p9), [#allocation3], %s855_s14  ;;  %s911_s6 = sshll.u32 (!%p195_p9), %s969_s5, 4  ;;  %s912_s6 = int_to_ptr.vmem [resolvable:$false] %s911_s6 }
  0x14   : > { %s780_s21 = sshll.u32 (!%p195_p9), %s232_s16, 4  ;;  %s913_s1 = scalar_lea.vmem (!%p195_p9), %s912_s6, 128  ;;  %s781_s21 = int_to_ptr.vmem [resolvable:$true] %s780_s21 }
  0x15   : > { %s1597_s28 = smov (!%p238_p10, %s856_s28), 124  ;;  %v1053_v0 = vld [vmem:[%s1585_s0] ss:$0 sm:$0xff]  ;;  %vm366_vm0 = vcmask 261120   ;;  %vm656_vm1 = vcmask 7168   ;;  %s907_s30 = scalar_lea.vmem %s781_s21, 64 }
  0x16   : > { %s857_s29 = sshll.u32 %s1597_s28, 3  ;;  %s778_s28 = scalar_lea.hbm %s1589_s4, %s867_s15 }
  0x17   : > { %s1060_s8 = scalar_lea.vmem %s1587_s2, %s857_s29  ;;  %s1102_s11 = scalar_lea.vmem %s1588_s3, %s857_s29 }
  0x18   : > { %v266_v1 = vld [vmem:[%s1060_s8 + $0x10] sm:$0xff]  ;;  %v264_v2 = vld [vmem:[%s1060_s8] sm:$0xff]  ;;  %v267_v3 = vld [vmem:[%s1060_s8 + $0x18] sm:$0xff]  ;;  %s766_s29 = scalar_lea.sflag [#allocation4], %s230_s13  ;;  %p908_p11 = scmp.ne.s32.totalorder %s781_s21, %s907_s30 }
  0x19   : > { %v336_v4 = vmul.f32 %v1053_v0, %v266_v1  ;;  %v334_v5 = vmul.f32 %v1053_v0, %v264_v2  ;;  %v337_v6 = vmul.f32 %v1053_v0, %v267_v3  ;;  %v265_v7 = vld [vmem:[%s1060_s8 + $0x8] sm:$0xff]  ;;  %v268_v10 = vld [vmem:[%s1060_s8 + $0x20] sm:$0xff]  ;;  %v271_v17 = vld [vmem:[%s1060_s8 + $0x38] sm:$0xff]  ;;  %p914_p0 = scmp.lt.s32.totalorder %s781_s21, %s912_s6  ;;  %p915_p1 = scmp.lt.s32.totalorder %s913_s1, %s907_s30 }
  0x1a   : > { %v335_v8 = vmul.f32 %v1053_v0, %v265_v7  ;;  %v269_v9 = vld [vmem:[%s1060_s8 + $0x28] sm:$0xff]  ;;  %v338_v16 = vmul.f32 %v1053_v0, %v268_v10  ;;  %v270_v18 = vld [vmem:[%s1060_s8 + $0x30] sm:$0xff]  ;;  %v272_v20 = vld [vmem:[%s1060_s8 + $0x40] sm:$0xff]  ;;  %v341_v26 = vmul.f32 %v1053_v0, %v271_v17  ;;  %p909_p12 = pnand %p908_p11, %p1036_p5 }
  0x1b   : > { %v373_v11 = vsel %vm366_vm0, %v336_v4, 0.0  ;;  %v367_v12 = vsel %vm366_vm0, %v334_v5, 0.0  ;;  %v376_v13 = vsel %vm366_vm0, %v337_v6, 0.0  ;;  %v339_v15 = vmul.f32 %v1053_v0, %v269_v9  ;;  %v273_v19 = vld [vmem:[%s1060_s8 + $0x48] sm:$0xff]  ;;  %v275_v21 = vld [vmem:[%s1060_s8 + $0x58] sm:$0xff]  ;;  %v274_v22 = vld [vmem:[%s1060_s8 + $0x50] sm:$0xff]  ;;  %p916_p2 = por %p915_p1, %p914_p0 }
  0x1c   : > { %374 = vadd.xlane.f32.xlu1 %v373_v11  ;;  %368 = vadd.xlane.f32.xlu0 %v367_v12  ;;  %v370_v14 = vsel %vm366_vm0, %v335_v8, 0.0  ;;  %v277_v23 = vld [vmem:[%s1060_s8 + $0x68] sm:$0xff]  ;;  %v379_v25 = vsel %vm366_vm0, %v338_v16, 0.0  ;;  %v340_v27 = vmul.f32 %v1053_v0, %v270_v18  ;;  %v276_v28 = vld [vmem:[%s1060_s8 + $0x60] sm:$0xff]  ;;  %v279_v29 = vld [vmem:[%s1060_s8 + $0x78] sm:$0xff]  ;;  %v343_v30 = vmul.f32 %v1053_v0, %v273_v19  ;;  %p910_p13 = pneg %p909_p12 }
  0x1d   : > { %v382_v24 = vsel %vm366_vm0, %v339_v15, 0.0  ;;  %v342_v31 = vmul.f32 %v1053_v0, %v272_v20  ;;  %v345_v32 = vmul.f32 %v1053_v0, %v275_v21  ;;  %v344_v33 = vmul.f32 %v1053_v0, %v274_v22  ;;  %v278_v35 = vld [vmem:[%s1060_s8 + $0x70] sm:$0xff]  ;;  %v281_v40 = vld [vmem:[%s1060_s8 + $0x88] sm:$0xff]  ;;  %v280_v41 = vld [vmem:[%s1060_s8 + $0x80] sm:$0xff] }
  0x1e   : > { %v347_v34 = vmul.f32 %v1053_v0, %v277_v23  ;;  %v346_v36 = vmul.f32 %v1053_v0, %v276_v28  ;;  %v349_v37 = vmul.f32 %v1053_v0, %v279_v29  ;;  %v388_v38 = vsel %vm366_vm0, %v341_v26, 0.0  ;;  %v283_v42 = vld [vmem:[%s1060_s8 + $0x98] sm:$0xff]  ;;  %v297_v46 = vld [vmem:[%s1102_s11 + $0x8] sm:$0xff]  ;;  %v296_v47 = vld [vmem:[%s1102_s11] sm:$0xff]  ;;  %p917_p3 = pnand %p916_p2, %p910_p13 }
  0x1f   : > { %v385_v39 = vsel %vm366_vm0, %v340_v27, 0.0  ;;  %v394_v43 = vsel %vm366_vm0, %v343_v30, 0.0  ;;  %v391_v44 = vsel %vm366_vm0, %v342_v31, 0.0  ;;  %v348_v45 = vmul.f32 %v1053_v0, %v278_v35  ;;  %v299_v48 = vld [vmem:[%s1102_s11 + $0x18] sm:$0xff]  ;;  %v298_v52 = vld [vmem:[%s1102_s11 + $0x10] sm:$0xff]  ;;  %v312_v53 = vld [vmem:[%s1102_s11 + $0x80] sm:$0xff] }
  0x20   : > { %377 = vadd.xlane.f32.xlu1 %v376_v13  ;;  %371 = vadd.xlane.f32.xlu0 %v370_v14  ;;  %v400_v49 = vsel %vm366_vm0, %v345_v32, 0.0  ;;  %v397_v50 = vsel %vm366_vm0, %v344_v33, 0.0  ;;  %v1120_v51 = vsel %vm366_vm0, %v347_v34, 0.0  ;;  %v300_v54 = vld [vmem:[%s1102_s11 + $0x20] sm:$0xff]  ;;  %v1126_v55 = vsel %vm366_vm0, %v346_v36, 0.0  ;;  %v314_v59 = vld [vmem:[%s1102_s11 + $0x90] sm:$0xff] }
  0x21   : > { %v1129_v56 = vsel %vm366_vm0, %v349_v37, 0.0  ;;  %v1132_v57 = vmul.f32 %v1053_v0, %v281_v40  ;;  %v1135_v58 = vmul.f32 %v1053_v0, %v280_v41  ;;  %v1139_v60 = vmul.f32 %v1053_v0, %v283_v42  ;;  %v313_v1 = vld [vmem:[%s1102_s11 + $0x88] sm:$0xff]  ;;  %v316_v6 = vld [vmem:[%s1102_s11 + $0xa0] sm:$0xff]  ;;  %v315_v7 = vld [vmem:[%s1102_s11 + $0x98] sm:$0xff] }
  0x22   : > { %v497_v61 = vmul.f32 %v1053_v0, %v297_v46  ;;  %v496_v62 = vmul.f32 %v1053_v0, %v296_v47  ;;  %v499_v63 = vmul.f32 %v1053_v0, %v299_v48  ;;  %v1146_v2 = vsel %vm366_vm0, %v348_v45, 0.0  ;;  %v317_v8 = vld [vmem:[%s1102_s11 + $0xa8] sm:$0xff]  ;;  %v318_v14 = vld [vmem:[%s1102_s11 + $0xb0] sm:$0xff]  ;;  %v319_v20 = vld [vmem:[%s1102_s11 + $0xb8] sm:$0xff] }
  0x23   : > { %v498_v3 = vmul.f32 %v1053_v0, %v298_v52  ;;  %v512_v4 = vmul.f32 %v1053_v0, %v312_v53  ;;  %v500_v5 = vmul.f32 %v1053_v0, %v300_v54  ;;  %v514_v12 = vmul.f32 %v1053_v0, %v314_v59  ;;  %v301_v13 = vld [vmem:[%s1102_s11 + $0x28] sm:$0xff]  ;;  %v302_v15 = vld [vmem:[%s1102_s11 + $0x30] sm:$0xff]  ;;  %v320_v30 = vld [vmem:[%s1102_s11 + $0xc0] sm:$0xff] }
  0x24   : > { %383 = vadd.xlane.f32.xlu1 %v382_v24  ;;  %380 = vadd.xlane.f32.xlu0 %v379_v25  ;;  %v1155_v9 = vsel %vm366_vm0, %v497_v61, 0.0  ;;  %v1158_v10 = vsel %vm366_vm0, %v496_v62, 0.0  ;;  %v1161_v11 = vsel %vm366_vm0, %v499_v63, 0.0  ;;  %v513_v19 = vmul.f32 %v1053_v0, %v313_v1  ;;  %v303_v25 = vld [vmem:[%s1102_s11 + $0x38] sm:$0xff]  ;;  %v304_v31 = vld [vmem:[%s1102_s11 + $0x40] sm:$0xff]  ;;  %v321_v32 = vld [vmem:[%s1102_s11 + $0xc8] sm:$0xff] }
  0x25   : > { %v1168_v16 = vsel %vm366_vm0, %v498_v3, 0.0  ;;  %v1171_v17 = vsel %vm366_vm0, %v512_v4, 0.0  ;;  %v1174_v18 = vsel %vm366_vm0, %v500_v5, 0.0  ;;  %v1179_v21 = vsel %vm366_vm0, %v514_v12, 0.0  ;;  %v305_v37 = vld [vmem:[%s1102_s11 + $0x48] sm:$0xff]  ;;  %v324_v59 = vld [vmem:[%s1102_s11 + $0xe0] sm:$0xff] }
  0x26   : > { %v516_v22 = vmul.f32 %v1053_v0, %v316_v6  ;;  %v515_v23 = vmul.f32 %v1053_v0, %v315_v7  ;;  %v517_v24 = vmul.f32 %v1053_v0, %v317_v8  ;;  %v1186_v26 = vsel %vm366_vm0, %v513_v19, 0.0  ;;  %v308_v61 = vld [vmem:[%s1102_s11 + $0x60] sm:$0xff]  ;;  %v325_v62 = vld [vmem:[%s1102_s11 + $0xe8] sm:$0xff]  ;;  %v326_v6 = vld [vmem:[%s1102_s11 + $0xf0] sm:$0xff] }
  0x27   : > { %v501_v27 = vmul.f32 %v1053_v0, %v301_v13  ;;  %v518_v28 = vmul.f32 %v1053_v0, %v318_v14  ;;  %v502_v29 = vmul.f32 %v1053_v0, %v302_v15  ;;  %v519_v36 = vmul.f32 %v1053_v0, %v319_v20  ;;  %v309_v5 = vld [vmem:[%s1102_s11 + $0x68] sm:$0xff]  ;;  %v310_v7 = vld [vmem:[%s1102_s11 + $0x70] sm:$0xff]  ;;  %v327_v15 = vld [vmem:[%s1102_s11 + $0xf8] sm:$0xff] }
  0x28   : > { %389 = vadd.xlane.f32.xlu1 %v388_v38  ;;  %386 = vadd.xlane.f32.xlu0 %v385_v39  ;;  %v1195_v33 = vsel %vm366_vm0, %v516_v22, 0.0  ;;  %v1198_v34 = vsel %vm366_vm0, %v515_v23, 0.0  ;;  %v1201_v35 = vsel %vm366_vm0, %v517_v24, 0.0  ;;  %v322_v38 = vld [vmem:[%s1102_s11 + $0xd0] sm:$0xff]  ;;  %v520_v46 = vmul.f32 %v1053_v0, %v320_v30  ;;  %v311_v22 = vld [vmem:[%s1102_s11 + $0x78] sm:$0xff] }
  0x29   : > { %v306_v39 = vld [vmem:[%s1102_s11 + $0x50] sm:$0xff]  ;;  %v1208_v40 = vsel %vm366_vm0, %v501_v27, 0.0  ;;  %v1211_v41 = vsel %vm366_vm0, %v518_v28, 0.0  ;;  %v1214_v42 = vsel %vm366_vm0, %v502_v29, 0.0  ;;  %v1219_v45 = vsel %vm366_vm0, %v519_v36, 0.0 }
  0x2a   : > { %v504_v47 = vmul.f32 %v1053_v0, %v304_v31  ;;  %v521_v48 = vmul.f32 %v1053_v0, %v321_v32  ;;  %v505_v52 = vmul.f32 %v1053_v0, %v305_v37  ;;  %v522_v53 = vmul.f32 %v1053_v0, %v322_v38  ;;  %v282_v23 = vld [vmem:[%s1060_s8 + $0x90] sm:$0xff] }
  0x2b   : > { %v506_v54 = vmul.f32 %v1053_v0, %v306_v39  ;;  %v1235_v63 = vsel %vm366_vm0, %v520_v46, 0.0  ;;  %v524_v20 = vmul.f32 %v1053_v0, %v324_v59  ;;  %v526_v27 = vmul.f32 %v1053_v0, %v326_v6  ;;  %v285_v46 = vld [vmem:[%s1060_s8 + $0xa8] sm:$0xff] }
  0x2c   : > { %395 = vadd.xlane.f32.xlu1 %v394_v43  ;;  %392 = vadd.xlane.f32.xlu0 %v391_v44  ;;  %v503_v43 = vmul.f32 %v1053_v0, %v303_v25  ;;  %v323_v44 = vld [vmem:[%s1102_s11 + $0xd8] sm:$0xff]  ;;  %v1238_v1 = vsel %vm366_vm0, %v504_v47, 0.0  ;;  %v1241_v3 = vsel %vm366_vm0, %v521_v48, 0.0  ;;  %v1250_v8 = vsel %vm366_vm0, %v505_v52, 0.0  ;;  %v284_v47 = vld [vmem:[%s1060_s8 + $0xa0] sm:$0xff] }
  0x2d   : > { %v523_v4 = vmul.f32 %v1053_v0, %v323_v44  ;;  %v1253_v12 = vsel %vm366_vm0, %v522_v53, 0.0  ;;  %v1256_v13 = vsel %vm366_vm0, %v506_v54, 0.0  ;;  %v509_v25 = vmul.f32 %v1053_v0, %v309_v5  ;;  %v287_v53 = vld [vmem:[%s1060_s8 + $0xb8] sm:$0xff]  ;;  %v286_v54 = vld [vmem:[%s1060_s8 + $0xb0] sm:$0xff]  ;;  %v288_v5 = vld [vmem:[%s1060_s8 + $0xc0] sm:$0xff] }
  0x2e   : > { %v510_v28 = vmul.f32 %v1053_v0, %v310_v7  ;;  %v1275_v29 = vsel %vm366_vm0, %v524_v20, 0.0  ;;  %v527_v32 = vmul.f32 %v1053_v0, %v327_v15  ;;  %v1290_v37 = vsel %vm366_vm0, %v526_v27, 0.0  ;;  %v291_v20 = vld [vmem:[%s1060_s8 + $0xd8] sm:$0xff]  ;;  %v293_v27 = vld [vmem:[%s1060_s8 + $0xe8] sm:$0xff] }
  0x2f   : > { %v1261_v19 = vsel %vm366_vm0, %v523_v4, 0.0  ;;  %v1287_v36 = vsel %vm366_vm0, %v509_v25, 0.0  ;;  %v511_v39 = vmul.f32 %v1053_v0, %v311_v22  ;;  %v354_v52 = vmul.f32 %v1053_v0, %v284_v47  ;;  %v289_v4 = vld [vmem:[%s1060_s8 + $0xc8] sm:$0xff] }
  0x30   : > { %401 = vadd.xlane.f32.xlu1 %v400_v49  ;;  %398 = vadd.xlane.f32.xlu0 %v397_v50  ;;  %v307_v49 = vld [vmem:[%s1102_s11 + $0x58] sm:$0xff]  ;;  %v1226_v50 = vsel %vm366_vm0, %v503_v43, 0.0  ;;  %v1293_v38 = vsel %vm366_vm0, %v510_v28, 0.0  ;;  %v418_v43 = vsel %vm366_vm0, %v1132_v57, 0.0  ;;  %v1302_v44 = vsel %vm366_vm0, %v527_v32, 0.0  ;;  %v292_v28 = vld [vmem:[%s1060_s8 + $0xe0] sm:$0xff] }
  0x31   : > { %v507_v14 = vmul.f32 %v1053_v0, %v307_v49  ;;  %v1307_v48 = vsel %vm366_vm0, %v511_v39, 0.0  ;;  %v424_v57 = vsel %vm366_vm0, %v1139_v60, 0.0  ;;  %v356_v60 = vmul.f32 %v1053_v0, %v286_v54 }
  0x32   : > { %v358_v15 = vmul.f32 %v1053_v0, %v288_v5 }
  0x33   : > { %v1269_v24 = vsel %vm366_vm0, %v507_v14, 0.0  ;;  %v433_v7 = vsel %vm366_vm0, %v356_v60, 0.0  ;;  %v359_v14 = vmul.f32 %v1053_v0, %v289_v4 }
  0x34   : > { %407 = vadd.xlane.f32.xlu1 %v1120_v51  ;;  %404 = vadd.xlane.f32.xlu0 %v1126_v55  ;;  %v508_v51 = vmul.f32 %v1053_v0, %v308_v61  ;;  %v525_v55 = vmul.f32 %v1053_v0, %v325_v62  ;;  %v427_v61 = vsel %vm366_vm0, %v354_v52, 0.0  ;;  %v357_v62 = vmul.f32 %v1053_v0, %v287_v53 }
  0x35   : > { %v439_v22 = vsel %vm366_vm0, %v358_v15, 0.0 }
  0x36   : > { %v1278_v30 = vsel %vm366_vm0, %v508_v51, 0.0  ;;  %v1281_v31 = vsel %vm366_vm0, %v525_v55, 0.0  ;;  %v436_v6 = vsel %vm366_vm0, %v357_v62, 0.0  ;;  %v290_v51 = vld [vmem:[%s1060_s8 + $0xd0] sm:$0xff]  ;;  %v442_v55 = vsel %vm366_vm0, %v359_v14, 0.0 }
  0x37   : > { %v360_v25 = vmul.f32 %v1053_v0, %v290_v51 }
  0x38   : > { %413 = vadd.xlane.f32.xlu1 %v1129_v56  ;;  %410 = vadd.xlane.f32.xlu0 %v1146_v2  ;;  %v415_v56 = vsel %vm366_vm0, %v1135_v58, 0.0  ;;  %v352_v2 = vmul.f32 %v1053_v0, %v282_v23  ;;  %v355_v58 = vmul.f32 %v1053_v0, %v285_v46  ;;  %v361_v23 = vmul.f32 %v1053_v0, %v291_v20  ;;  %v294_v46 = vld [vmem:[%s1060_s8 + $0xf0] sm:$0xff] }
  0x39   : > { %v445_v39 = vsel %vm366_vm0, %v360_v25, 0.0 }
  0x3a   : > { %v421_v49 = vsel %vm366_vm0, %v352_v2, 0.0  ;;  %v430_v59 = vsel %vm366_vm0, %v355_v58, 0.0  ;;  %v448_v32 = vsel %vm366_vm0, %v361_v23, 0.0  ;;  %v295_v2 = vld [vmem:[%s1060_s8 + $0xf8] sm:$0xff]  ;;  %v364_v58 = vmul.f32 %v1053_v0, %v294_v46 }
  0x3c   : > { %419 = vadd.xlane.f32.xlu1 %v418_v43  ;;  %416 = vadd.xlane.f32.xlu0 %v415_v56  ;;  %v363_v43 = vmul.f32 %v1053_v0, %v293_v27  ;;  %v362_v56 = vmul.f32 %v1053_v0, %v292_v28  ;;  %v457_v53 = vsel %vm366_vm0, %v364_v58, 0.0 }
  0x3e   : > { %v454_v47 = vsel %vm366_vm0, %v363_v43, 0.0 }
  0x40   : > { %425 = vadd.xlane.f32.xlu1 %v424_v57  ;;  %422 = vadd.xlane.f32.xlu0 %v421_v49  ;;  %v451_v57 = vsel %vm366_vm0, %v362_v56, 0.0  ;;  %v365_v49 = vmul.f32 %v1053_v0, %v295_v2 }
  0x42   : > { %v460_v52 = vsel %vm366_vm0, %v365_v49, 0.0 }
  0x44   : > { %431 = vadd.xlane.f32.xlu1 %v430_v59  ;;  %428 = vadd.xlane.f32.xlu0 %v427_v61 }
  0x48   : > { %437 = vadd.xlane.f32.xlu1 %v436_v6  ;;  %434 = vadd.xlane.f32.xlu0 %v433_v7 }
  0x4c   : > { %443 = vadd.xlane.f32.xlu1 %v442_v55  ;;  %440 = vadd.xlane.f32.xlu0 %v439_v22 }
  0x50   : > { %449 = vadd.xlane.f32.xlu1 %v448_v32  ;;  %446 = vadd.xlane.f32.xlu0 %v445_v39 }
  0x54   : > { %455 = vadd.xlane.f32.xlu1 %v454_v47  ;;  %452 = vadd.xlane.f32.xlu0 %v451_v57 }
  0x58   : > { %461 = vadd.xlane.f32.xlu1 %v460_v52  ;;  %458 = vadd.xlane.f32.xlu0 %v457_v53 }
  0x5c   : > { %532 = vadd.xlane.f32.xlu1 %v1155_v9  ;;  %529 = vadd.xlane.f32.xlu0 %v1158_v10 }
  0x60   : > { %538 = vadd.xlane.f32.xlu1 %v1161_v11  ;;  %535 = vadd.xlane.f32.xlu0 %v1168_v16 }
  0x64   : > { %577 = vadd.xlane.f32.xlu1 %v1171_v17  ;;  %541 = vadd.xlane.f32.xlu0 %v1174_v18 }
  0x68   : > { %583 = vadd.xlane.f32.xlu1 %v1179_v21  ;;  %580 = vadd.xlane.f32.xlu0 %v1186_v26 }
  0x6c   : > { %589 = vadd.xlane.f32.xlu1 %v1195_v33  ;;  %586 = vadd.xlane.f32.xlu0 %v1198_v34 }
  0x70   : > { %592 = vadd.xlane.f32.xlu1 %v1201_v35  ;;  %544 = vadd.xlane.f32.xlu0 %v1208_v40 }
  0x74   : > { %595 = vadd.xlane.f32.xlu1 %v1211_v41  ;;  %547 = vadd.xlane.f32.xlu0 %v1214_v42 }
  0x78   : > { %598 = vadd.xlane.f32.xlu1 %v1219_v45  ;;  %550 = vadd.xlane.f32.xlu0 %v1226_v50 }
  0x7c   : > { %601 = vadd.xlane.f32.xlu1 %v1235_v63  ;;  %553 = vadd.xlane.f32.xlu0 %v1238_v1 }
  0x80   : > { %604 = vadd.xlane.f32.xlu1 %v1241_v3  ;;  %556 = vadd.xlane.f32.xlu0 %v1250_v8 }
  0x84   : > { %607 = vadd.xlane.f32.xlu1 %v1253_v12  ;;  %559 = vadd.xlane.f32.xlu0 %v1256_v13 }
  0x88   : > { %610 = vadd.xlane.f32.xlu1 %v1261_v19  ;;  %562 = vadd.xlane.f32.xlu0 %v1269_v24 }
  0x8c   : > { %613 = vadd.xlane.f32.xlu1 %v1275_v29  ;;  %565 = vadd.xlane.f32.xlu0 %v1278_v30 }
  0x90   : > { %616 = vadd.xlane.f32.xlu1 %v1281_v31  ;;  %568 = vadd.xlane.f32.xlu0 %v1287_v36 }
  0x94   : > { %619 = vadd.xlane.f32.xlu1 %v1290_v37  ;;  %571 = vadd.xlane.f32.xlu0 %v1293_v38 }
  0x98   : > { %622 = vadd.xlane.f32.xlu1 %v1302_v44  ;;  %574 = vadd.xlane.f32.xlu0 %v1307_v48  ;;  %v1428_v48 = vstv %s263_s12 }
  0xa5   : > { %v375_v0 = vpop.xlane.xlu1 %374  ;;  %v369_v9 = vpop.xlane.xlu0 %368 }
  0xa6   : > { %v464_v61 = vadd.f32 %v1428_v48, %v369_v9  ;;  %v466_v55 = vadd.f32 %v1428_v48, %v375_v0 }
  0xa9   : > { %v378_v10 = vpop.xlane.xlu1 %377  ;;  %v372_v11 = vpop.xlane.xlu0 %371 }
  0xaa   : > { %v465_v7 = vadd.f32 %v1428_v48, %v372_v11  ;;  %v467_v43 = vadd.f32 %v1428_v48, %v378_v10 }
  0xad   : > { %v1378_v16 = vpop.xlane.xlu1 %383  ;;  %v1380_v17 = vpop.xlane.xlu0 %380 }
  0xae   : > { %v468_v53 = vadd.f32 %v1428_v48, %v1380_v17 }
  0xb1   : > { %v1382_v18 = vpop.xlane.xlu1 %389  ;;  %v1384_v21 = vpop.xlane.xlu0 %386 }
  0xb5   : > { %v1386_v26 = vpop.xlane.xlu1 %395  ;;  %v1388_v33 = vpop.xlane.xlu0 %392 }
  0xb9   : > { %v1390_v34 = vpop.xlane.xlu1 %401  ;;  %v1392_v35 = vpop.xlane.xlu0 %398 }
  0xbd   : > { %v1394_v40 = vpop.xlane.xlu1 %407  ;;  %v1396_v41 = vpop.xlane.xlu0 %404 }
  0xc1   : > { %v1398_v42 = vpop.xlane.xlu1 %413  ;;  %v1400_v45 = vpop.xlane.xlu0 %410 }
  0xc5   : > { %v420_v50 = vpop.xlane.xlu1 %419  ;;  %v417_v63 = vpop.xlane.xlu0 %416 }
  0xc6   : > { %v480_v22 = vadd.f32 %v1428_v48, %v417_v63  ;;  %v481_v56 = vadd.f32 %v1428_v48, %v420_v50 }
  0xc9   : > { %v1402_v1 = vpop.xlane.xlu1 %425  ;;  %v423_v3 = vpop.xlane.xlu0 %422 }
  0xca   : > { %v482_v0 = vadd.f32 %v1428_v48, %v423_v3 }
  0xcd   : > { %v1404_v8 = vpop.xlane.xlu1 %431  ;;  %v1406_v12 = vpop.xlane.xlu0 %428 }
  0xd1   : > { %v1408_v13 = vpop.xlane.xlu1 %437  ;;  %v1410_v19 = vpop.xlane.xlu0 %434 }
  0xd5   : > { %v1412_v24 = vpop.xlane.xlu1 %443  ;;  %v1414_v29 = vpop.xlane.xlu0 %440 }
  0xd9   : > { %v1416_v30 = vpop.xlane.xlu1 %449  ;;  %v1418_v31 = vpop.xlane.xlu0 %446 }
  0xdd   : > { %v1420_v36 = vpop.xlane.xlu1 %455  ;;  %v1422_v37 = vpop.xlane.xlu0 %452 }
  0xe1   : > { %v1424_v38 = vpop.xlane.xlu1 %461  ;;  %v1426_v44 = vpop.xlane.xlu0 %458 }
  0xe5   : > { %v533_v54 = vpop.xlane.xlu1 %532  ;;  %v530_v59 = vpop.xlane.xlu0 %529 }
  0xe6   : > { %v624_v62 = vadd.f32 %v530_v59, %v1428_v48  ;;  %v625_v60 = vadd.f32 %v533_v54, %v1428_v48  ;;  %v469_v54 = vadd.f32 %v1428_v48, %v1378_v16  ;;  %v483_v59 = vadd.f32 %v1428_v48, %v1402_v1 }
  0xe7   : > { %v484_v16 = vadd.f32 %v1428_v48, %v1406_v12 }
  0xe8   : > { %v657_v4 = vsel %vm656_vm1, %v464_v61, %v624_v62  ;;  %v658_v15 = vsel %vm656_vm1, %v465_v7, %v625_v60 }
  0xe9   : > { %v539_v5 = vpop.xlane.xlu1 %538  ;;  %689 = vxpose.xlu0.b32.start [1/16] (narrow) %v657_v4, 8  ;;  %v536_v6 = vpop.xlane.xlu0 %535 }
  0xea   : > { %v626_v14 = vadd.f32 %v536_v6, %v1428_v48  ;;  %v627_v25 = vadd.f32 %v539_v5, %v1428_v48  ;;  %v470_v5 = vadd.f32 %v1428_v48, %v1384_v21  ;;  %v485_v21 = vadd.f32 %v1428_v48, %v1404_v8 }
  0xec   : > { %v659_v28 = vsel %vm656_vm1, %v466_v55, %v626_v14  ;;  %v660_v57 = vsel %vm656_vm1, %v467_v43, %v627_v25 }
  0xed   : > { %v578_v20 = vpop.xlane.xlu1 %577  ;;  %690 = vxpose.xlu0.b32.cont [2/16] (narrow) %v658_v15, 8  ;;  %v542_v51 = vpop.xlane.xlu0 %541 }
  0xee   : > { %v640_v23 = vadd.f32 %v578_v20, %v1428_v48  ;;  %v628_v46 = vadd.f32 %v542_v51, %v1428_v48  ;;  %v471_v51 = vadd.f32 %v1428_v48, %v1382_v18  ;;  %v486_v18 = vadd.f32 %v1428_v48, %v1410_v19 }
  0xf0   : > { %v673_v27 = vsel %vm656_vm1, %v480_v22, %v640_v23  ;;  %v661_v10 = vsel %vm656_vm1, %v468_v53, %v628_v46  ;;  %v473_v46 = vadd.f32 %v1428_v48, %v1386_v26  ;;  %v474_v53 = vadd.f32 %v1428_v48, %v1392_v35 }
  0xf1   : > { %v584_v32 = vpop.xlane.xlu1 %583  ;;  %721 = vxpose.xlu1.b32.start [1/16] (narrow) %v673_v27, 8  ;;  %691 = vxpose.xlu0.b32.cont [3/16] (narrow) %v659_v28, 8  ;;  %v581_v39 = vpop.xlane.xlu0 %580  ;;  %v472_v28 = vadd.f32 %v1428_v48, %v1388_v33  ;;  %v487_v33 = vadd.f32 %v1428_v48, %v1408_v13  ;;  %v488_v26 = vadd.f32 %v1428_v48, %v1414_v29 }
  0xf2   : > { %v641_v2 = vadd.f32 %v581_v39, %v1428_v48  ;;  %v642_v47 = vadd.f32 %v584_v32, %v1428_v48  ;;  %v489_v35 = vadd.f32 %v1428_v48, %v1412_v24 }
  0xf4   : > { %v674_v49 = vsel %vm656_vm1, %v481_v56, %v641_v2  ;;  %v675_v11 = vsel %vm656_vm1, %v482_v0, %v642_v47 }
  0xf5   : > { %v590_v58 = vpop.xlane.xlu1 %589  ;;  %692 = vxpose.xlu0.b32.cont [4/16] (narrow) %v660_v57, 8  ;;  %722 = vxpose.xlu1.b32.cont [2/16] (narrow) %v674_v49, 8  ;;  %v587_v52 = vpop.xlane.xlu0 %586 }
  0xf6   : > { %v643_v9 = vadd.f32 %v587_v52, %v1428_v48  ;;  %v644_v3 = vadd.f32 %v590_v58, %v1428_v48 }
  0xf8   : > { %v676_v61 = vsel %vm656_vm1, %v483_v59, %v643_v9  ;;  %v677_v7 = vsel %vm656_vm1, %v484_v16, %v644_v3 }
  0xf9   : > { %v593_v50 = vpop.xlane.xlu1 %592  ;;  %693 = vxpose.xlu0.b32.cont [5/16] (narrow) %v661_v10, 8  ;;  %723 = vxpose.xlu1.b32.cont [3/16] (narrow) %v675_v11, 8  ;;  %v545_v63 = vpop.xlane.xlu0 %544 }
  0xfa   : > { %v629_v17 = vadd.f32 %v545_v63, %v1428_v48  ;;  %v645_v6 = vadd.f32 %v593_v50, %v1428_v48  ;;  %v475_v63 = vadd.f32 %v1428_v48, %v1390_v34  ;;  %v490_v34 = vadd.f32 %v1428_v48, %v1418_v31 }
  0xfc   : > { %v662_v62 = vsel %vm656_vm1, %v469_v54, %v629_v17  ;;  %v678_v22 = vsel %vm656_vm1, %v485_v21, %v645_v6  ;;  %v477_v6 = vadd.f32 %v1428_v48, %v1394_v40  ;;  %v492_v40 = vadd.f32 %v1428_v48, %v1422_v37 }
  0xfd   : > { %v596_v60 = vpop.xlane.xlu1 %595  ;;  %724 = vxpose.xlu1.b32.cont [4/16] (narrow) %v676_v61, 8  ;;  %694 = vxpose.xlu0.b32.cont [6/16] (narrow) %v662_v62, 8  ;;  %v548_v4 = vpop.xlane.xlu0 %547  ;;  %v476_v62 = vadd.f32 %v1428_v48, %v1396_v41  ;;  %v491_v41 = vadd.f32 %v1428_v48, %v1416_v30  ;;  %v494_v30 = vadd.f32 %v1428_v48, %v1426_v44 }
  0xfe   : > { %v630_v1 = vadd.f32 %v548_v4, %v1428_v48  ;;  %v646_v55 = vadd.f32 %v596_v60, %v1428_v48 }
 0x100   : > { %v663_v14 = vsel %vm656_vm1, %v470_v5, %v630_v1  ;;  %v679_v39 = vsel %vm656_vm1, %v486_v18, %v646_v55  ;;  %v495_v18 = vadd.f32 %v1428_v48, %v1424_v38 }
 0x101   : > { %v599_v15 = vpop.xlane.xlu1 %598  ;;  %725 = vxpose.xlu1.b32.cont [5/16] (narrow) %v677_v7, 8  ;;  %695 = vxpose.xlu0.b32.cont [7/16] (narrow) %v663_v14, 8  ;;  %v551_v20 = vpop.xlane.xlu0 %550 }
 0x102   : > { %v631_v12 = vadd.f32 %v551_v20, %v1428_v48  ;;  %v647_v32 = vadd.f32 %v599_v15, %v1428_v48  ;;  %v478_v20 = vadd.f32 %v1428_v48, %v1400_v45 }
 0x104   : > { %v664_v23 = vsel %vm656_vm1, %v471_v51, %v631_v12  ;;  %v680_v57 = vsel %vm656_vm1, %v487_v33, %v647_v32 }
 0x105   : > { %v602_v25 = vpop.xlane.xlu1 %601  ;;  %726 = vxpose.xlu1.b32.cont [6/16] (narrow) %v678_v22, 8  ;;  %696 = vxpose.xlu0.b32.cont [8/16] (narrow) %v664_v23, 8  ;;  %v554_v27 = vpop.xlane.xlu0 %553 }
 0x106   : > { %v632_v8 = vadd.f32 %v554_v27, %v1428_v48  ;;  %v648_v47 = vadd.f32 %v602_v25, %v1428_v48  ;;  %v479_v27 = vadd.f32 %v1428_v48, %v1398_v42 }
 0x108   : > { %v665_v43 = vsel %vm656_vm1, %v472_v28, %v632_v8  ;;  %v681_v9 = vsel %vm656_vm1, %v488_v26, %v648_v47  ;;  %v493_v28 = vadd.f32 %v1428_v48, %v1420_v36 }
 0x109   : > { %v605_v56 = vpop.xlane.xlu1 %604  ;;  %727 = vxpose.xlu1.b32.cont [7/16] (narrow) %v679_v39, 8  ;;  %697 = vxpose.xlu0.b32.cont [9/16] (narrow) %v665_v43, 8  ;;  %v557_v2 = vpop.xlane.xlu0 %556 }
 0x10a   : > { %v633_v19 = vadd.f32 %v557_v2, %v1428_v48  ;;  %v649_v0 = vadd.f32 %v605_v56, %v1428_v48 }
 0x10c   : > { %v666_v49 = vsel %vm656_vm1, %v473_v46, %v633_v19  ;;  %v682_v59 = vsel %vm656_vm1, %v489_v35, %v649_v0 }
 0x10d   : > { %v608_v58 = vpop.xlane.xlu1 %607  ;;  %728 = vxpose.xlu1.b32.cont [8/16] (narrow) %v680_v57, 8  ;;  %698 = vxpose.xlu0.b32.cont [10/16] (narrow) %v666_v49, 8  ;;  %v560_v52 = vpop.xlane.xlu0 %559 }
 0x10e   : > { %v634_v13 = vadd.f32 %v560_v52, %v1428_v48  ;;  %v650_v54 = vadd.f32 %v608_v58, %v1428_v48 }
 0x110   : > { %v667_v10 = vsel %vm656_vm1, %v474_v53, %v634_v13  ;;  %v683_v4 = vsel %vm656_vm1, %v490_v34, %v650_v54 }
 0x111   : > { %v611_v11 = vpop.xlane.xlu1 %610  ;;  %729 = vxpose.xlu1.b32.cont [9/16] (narrow) %v681_v9, 8  ;;  %699 = vxpose.xlu0.b32.cont [11/16] (narrow) %v667_v10, 8  ;;  %v563_v50 = vpop.xlane.xlu0 %562 }
 0x112   : > { %v635_v29 = vadd.f32 %v563_v50, %v1428_v48  ;;  %v651_v60 = vadd.f32 %v611_v11, %v1428_v48 }
 0x114   : > { %v668_v17 = vsel %vm656_vm1, %v475_v63, %v635_v29  ;;  %v684_v14 = vsel %vm656_vm1, %v491_v41, %v651_v60 }
 0x115   : > { %v614_v3 = vpop.xlane.xlu1 %613  ;;  %730 = vxpose.xlu1.b32.cont [10/16] (narrow) %v682_v59, 8  ;;  %700 = vxpose.xlu0.b32.cont [12/16] (narrow) %v668_v17, 8  ;;  %v566_v61 = vpop.xlane.xlu0 %565 }
 0x116   : > { %v636_v24 = vadd.f32 %v566_v61, %v1428_v48  ;;  %v652_v7 = vadd.f32 %v614_v3, %v1428_v48 }
 0x118   : > { %v669_v5 = vsel %vm656_vm1, %v476_v62, %v636_v24  ;;  %v685_v23 = vsel %vm656_vm1, %v492_v40, %v652_v7 }
 0x119   : > { %v617_v16 = vpop.xlane.xlu1 %616  ;;  %731 = vxpose.xlu1.b32.cont [11/16] (narrow) %v683_v4, 8  ;;  %701 = vxpose.xlu0.b32.cont [13/16] (narrow) %v669_v5, 8  ;;  %v569_v1 = vpop.xlane.xlu0 %568 }
 0x11a   : > { %v637_v31 = vadd.f32 %v569_v1, %v1428_v48  ;;  %v653_v22 = vadd.f32 %v617_v16, %v1428_v48 }
 0x11c   : > { %v670_v15 = vsel %vm656_vm1, %v477_v6, %v637_v31  ;;  %v686_v39 = vsel %vm656_vm1, %v493_v28, %v653_v22 }
 0x11d   : > { %v620_v51 = vpop.xlane.xlu1 %619  ;;  %732 = vxpose.xlu1.b32.cont [12/16] (narrow) %v684_v14, 8  ;;  %702 = vxpose.xlu0.b32.cont [14/16] (narrow) %v670_v15, 8  ;;  %v572_v21 = vpop.xlane.xlu0 %571 }
 0x11e   : > { %v654_v12 = vadd.f32 %v620_v51, %v1428_v48  ;;  %v638_v55 = vadd.f32 %v572_v21, %v1428_v48 }
 0x120   : > { %v671_v45 = vsel %vm656_vm1, %v478_v20, %v638_v55  ;;  %v687_v25 = vsel %vm656_vm1, %v494_v30, %v654_v12 }
 0x121   : > { %v623_v37 = vpop.xlane.xlu1 %622  ;;  %733 = vxpose.xlu1.b32.cont [13/16] (narrow) %v685_v23, 8  ;;  %703 = vxpose.xlu0.b32.cont [15/16] (narrow) %v671_v45, 8  ;;  %v575_v44 = vpop.xlane.xlu0 %574 }
 0x122   : > { %v655_v8 = vadd.f32 %v623_v37, %v1428_v48  ;;  %v639_v32 = vadd.f32 %v575_v44, %v1428_v48 }
 0x124   : > { %v672_v42 = vsel %vm656_vm1, %v479_v27, %v639_v32  ;;  %v688_v43 = vsel %vm656_vm1, %v495_v18, %v655_v8 }
 0x125   : > { %734 = vxpose.xlu1.b32.cont [14/16] (narrow) %v686_v39, 8  ;;  %704 = vxpose.xlu0.b32.end [16/16] (narrow) %v672_v42, 8 }
 0x129   : > { %735 = vxpose.xlu1.b32.cont [15/16] (narrow) %v687_v25, 8 }
 0x12d   : > { %736 = vxpose.xlu1.b32.end [16/16] (narrow) %v688_v43, 8 }
 0x165   : > { %v705_v36 = vpop.trf.xlu0 }
 0x16d   : > { %v737_v38 = vpop.trf.xlu1 }
 0x16e   : > { %v755_v56 = vcombine.low %v705_v36, %v737_v38 }
 0x170   : > { %861 = vst.sshfl [vmem:[%s232_s16] sm:$0x33 pattern:$0x76325410] %v755_v56 }
 0x171   : > { %920 = shalt.err (!%p917_p3)
}
 0x172   : > { %s921_s7 = scalar_lea.hbm %s778_s28, 64  ;;  %s925_s10 = scalar_lea.hbm %s1589_s4, 256 }
 0x173   : > { %p922_p4 = scmp.ne.s32.totalorder %s778_s28, %s921_s7  ;;  %p926_p9 = scmp.lt.s32.totalorder %s778_s28, %s1589_s4 }
 0x174   : > { %p927_p10 = scmp.lt.s32.totalorder %s925_s10, %s921_s7 }
 0x175   : > { %p923_p7 = pnand %p922_p4, %p1036_p5 }
 0x176   : > { %p928_p11 = por %p927_p10, %p926_p9 }
 0x177   : > { %p924_p8 = pneg %p923_p7 }
 0x179   : > { %p929_p12 = pnand %p928_p11, %p924_p8 }
 0x17b   : > { %932 = shalt.err (!%p929_p12)
}
 0x17c   : > { %868 = dma.vmem_to_hbm [thread:$0]  (%p1036_p5), %s781_s21, 64, %s778_s28, %s766_s29  }
 0x17d PF: > { %p874_p13 = scmp.ge.s32.totalorder %s967_s20, 2  ;;  %s792_s13 = sand.u32 1, %s955_s17  }
 0x17e   : > { %s793_s14 = scalar_lea.sflag [#allocation4], %s792_s13 }
 0x17f   : > { %p871_p0 = pnand %p874_p13, %p1040_p6 }
 0x181   : > { %p872_p1 = pneg %p871_p0 }
 0x183   : > { %950 = dma.done.wait (%p872_p1), %s793_s14, 64  }
 0x184   : > { %952 = vsyncadd (%p872_p1), %s793_s14, 4294967232  ;;  %p15_p2 = scmp.ge.s32.totalorder %s1023_s22, 6   ;;  %s1592_s17 = smov %s959_s18 }
 0x185   : > { %s1593_s18 = smov %s963_s19  ;;  %s1594_s19 = smov %s1034_s25 }
 0x186   : > { %s1595_s20 = smov %s1023_s22  ;;  %17 = sbr.rel (!%p15_p2) target bundleno = 5 (0x5), region = 74 }
 0x18b   :  { %798 = vsyncpa [#allocation4], 1 }
 0x18c   :  { %800 = vsyncpa [#allocation4 + $0x1], 1 }

</bundles_post_ra>
